<compile_context>
chip_gen: v7x
topology: tpu7x:2x2x1
jax: 0.10.0
libtpu: 0.0.40
codegen_flags: <defaults>
</compile_context>

<pallas_src>
import functools

import jax
import jax.numpy as jnp
from jax import lax
from jax.experimental import pallas as pl
from jax.experimental.pallas import tpu as pltpu


def layer_norm2d_kernel(x_ref, g_ref, b_ref, o_ref, *, eps, inv_c):
    # x_ref/o_ref: (C, T) with T lane-dense.  g_ref/b_ref: (C, 1).
    x = x_ref[...].astype(jnp.float32)                   # (C, T)
    # Single-pass statistics over the channel (sublane) axis.
    s1 = jnp.sum(x, axis=0, keepdims=True)               # (1, T)
    s2 = jnp.sum(x * x, axis=0, keepdims=True)           # (1, T)
    mean = s1 * inv_c
    var = jnp.maximum(s2 * inv_c - mean * mean, 0.0)     # biased variance
    inv = lax.rsqrt(var + eps)                           # EUP rsqrt (free slot)
    g = g_ref[...]                                       # (C, 1) lane broadcast
    b = b_ref[...]                                       # (C, 1)
    o_ref[...] = ((x - mean) * inv * g + b).astype(o_ref.dtype)


def _tpu_budgets():
    """Generation-aware (per-tile budget, scoped vmem limit)."""
    tile_budget = 8 << 20          # v5e / v6e: 128 MiB physical VMEM
    vmem_limit = 64 * 1024 * 1024
    try:
        cap = int(pltpu.get_tpu_info().vmem_capacity_bytes)
        if cap <= 64 * 1024 * 1024:   # v7x-class: 64 MiB physical VMEM
            tile_budget = 2 << 20
            vmem_limit = 48 * 1024 * 1024
    except Exception:
        pass
    return tile_budget, vmem_limit


def _pick_hw_tile(hw, c, n, itemsize, budget_bytes):
    """Largest 128-multiple tile dividing hw, under the VMEM budget, that still
    leaves enough grid steps (>= min(8, max possible)) to pipeline."""
    assert hw % 128 == 0
    k = hw // 128
    max_steps = n * k
    target_steps = min(8, max_steps)
    best = 128
    for d in range(1, k + 1):
        if k % d != 0:
            continue
        tile = d * 128
        if c * tile * itemsize > budget_bytes:
            continue
        if n * (hw // tile) < target_steps:
            continue
        best = max(best, tile)
    return best


def layer_norm2d(x, gamma, beta, eps=1e-5):
    """x: (N, C, H, W). gamma, beta: (C,). Matches PyTorch LayerNorm2d forward."""
    N, C, H, W = x.shape
    HW = H * W
    xf = x.reshape(N, C, HW)                             # lane-dense spatial axis

    # Pad the spatial axis to a multiple of 128 (unmasked vst; padded lanes
    # are independent spatial positions and are sliced away afterwards).
    HW_pad = ((HW + 127) // 128) * 128
    if HW_pad != HW:
        xf = jnp.pad(xf, ((0, 0), (0, 0), (0, HW_pad - HW)))

    g = gamma.reshape(C, 1).astype(jnp.float32)
    b = beta.reshape(C, 1).astype(jnp.float32)

    tile_budget, vmem_limit = _tpu_budgets()
    tile = _pick_hw_tile(HW_pad, C, N, xf.dtype.itemsize, tile_budget)
    grid = (N, HW_pad // tile)

    kernel = functools.partial(layer_norm2d_kernel, eps=float(eps), inv_c=1.0 / C)
    out = pl.pallas_call(
        kernel,
        out_shape=jax.ShapeDtypeStruct((N, C, HW_pad), x.dtype),
        grid_spec=pl.GridSpec(
            grid=grid,
            in_specs=[
                pl.BlockSpec((pl.Squeezed(), C, tile), lambda n, t: (n, 0, t)),
                pl.BlockSpec((C, 1), lambda n, t: (0, 0)),
                pl.BlockSpec((C, 1), lambda n, t: (0, 0)),
            ],
            out_specs=pl.BlockSpec((pl.Squeezed(), C, tile), lambda n, t: (n, 0, t)),
        ),
        compiler_params=pltpu.CompilerParams(
            dimension_semantics=("parallel", "parallel"),
            vmem_limit_bytes=vmem_limit,
        ),
    )(xf, g, b)

    if HW_pad != HW:
        out = out[:, :, :HW]
    return out.reshape(N, C, H, W)


def layer_norm2d_ref(x, gamma, beta, eps=1e-5):
    """Pure-JAX reference matching the PyTorch LayerNorm2d forward."""
    xt = jnp.transpose(x, (0, 2, 3, 1))                       # (N, H, W, C)
    mean = jnp.mean(xt, axis=-1, keepdims=True)
    var = jnp.mean((xt - mean) ** 2, axis=-1, keepdims=True)  # biased
    y = (xt - mean) / jnp.sqrt(var + eps) * gamma + beta
    return jnp.transpose(y, (0, 3, 1, 2))


if __name__ == "__main__":
    # Small shapes consistent with the module: batch=2, channels=4, spatial=16.
    N, C, H, W = 2, 4, 16, 16

    key = jax.random.PRNGKey(0)
    kx, kg, kb = jax.random.split(key, 3)

    x = jax.random.normal(kx, (N, C, H, W), dtype=jnp.float32)
    gamma = 1.0 + 0.1 * jax.random.normal(kg, (C,), dtype=jnp.float32)
    beta = 0.1 * jax.random.normal(kb, (C,), dtype=jnp.float32)

    out = layer_norm2d(x, gamma, beta)
    out = jax.block_until_ready(out)

    ref = layer_norm2d_ref(x, gamma, beta)
    assert out.shape == (N, C, H, W)
    assert jnp.allclose(out, ref, atol=1e-4, rtol=1e-4), "mismatch vs reference"

    print("KERNEL_OK")
</pallas_src>

<mosaic_0001>
module attributes {stable_mosaic.version = 11 : i64} {
  func.func @layer_norm2d_kernel(%arg0: i32, %arg1: i32, %arg2: memref<1x4x128xf32, #tpu.memory_space<vmem>>, %arg3: memref<4x1xf32, #tpu.memory_space<vmem>>, %arg4: memref<4x1xf32, #tpu.memory_space<vmem>>, %arg5: memref<1x4x128xf32, #tpu.memory_space<vmem>>) attributes {dimension_semantics = [#tpu.dimension_semantics<parallel>, #tpu.dimension_semantics<parallel>], iteration_bounds = array<i64: 2, 2>, scalar_prefetch = 0 : i64, scratch_operands = 0 : i64, tpu.core_type = #tpu.core_type<tc>, window_params = [{transform_indices = @transform_0, window_bounds = array<i64: 1, 4, 128>}, {pipeline_mode = #tpu.pipeline_mode<synchronous>, transform_indices = @transform_1, window_bounds = array<i64: 4, 1>}, {pipeline_mode = #tpu.pipeline_mode<synchronous>, transform_indices = @transform_2, window_bounds = array<i64: 4, 1>}, {transform_indices = @transform_3, window_bounds = array<i64: 1, 4, 128>}]} {
    %c0 = arith.constant 0 : index
    %c0_0 = arith.constant 0 : index
    %c0_1 = arith.constant 0 : index
    %0 = vector.load %arg2[%c0, %c0_0, %c0_1] : memref<1x4x128xf32, #tpu.memory_space<vmem>>, vector<1x4x128xf32>
    %1 = vector.shape_cast %0 : vector<1x4x128xf32> to vector<4x128xf32>
    %cst = arith.constant dense<0.000000e+00> : vector<128xf32>
    %2 = vector.multi_reduction <add>, %1, %cst [0] : vector<4x128xf32> to vector<128xf32>
    %3 = vector.shape_cast %2 : vector<128xf32> to vector<1x128xf32>
    %4 = arith.mulf %1, %1 : vector<4x128xf32>
    %cst_2 = arith.constant dense<0.000000e+00> : vector<128xf32>
    %5 = vector.multi_reduction <add>, %4, %cst_2 [0] : vector<4x128xf32> to vector<128xf32>
    %6 = vector.shape_cast %5 : vector<128xf32> to vector<1x128xf32>
    %cst_3 = arith.constant 2.500000e-01 : f32
    %7 = vector.broadcast %cst_3 : f32 to vector<1x128xf32>
    %8 = arith.mulf %3, %7 : vector<1x128xf32>
    %cst_4 = arith.constant 2.500000e-01 : f32
    %9 = vector.broadcast %cst_4 : f32 to vector<1x128xf32>
    %10 = arith.mulf %6, %9 : vector<1x128xf32>
    %11 = arith.mulf %8, %8 : vector<1x128xf32>
    %12 = arith.subf %10, %11 : vector<1x128xf32>
    %cst_5 = arith.constant 0.000000e+00 : f32
    %13 = vector.broadcast %cst_5 : f32 to vector<1x128xf32>
    %14 = arith.maximumf %12, %13 : vector<1x128xf32>
    %cst_6 = arith.constant 9.99999974E-6 : f32
    %15 = vector.broadcast %cst_6 : f32 to vector<1x128xf32>
    %16 = arith.addf %14, %15 : vector<1x128xf32>
    %17 = math.rsqrt %16 : vector<1x128xf32>
    %c0_7 = arith.constant 0 : index
    %c0_8 = arith.constant 0 : index
    %18 = vector.load %arg3[%c0_7, %c0_8] : memref<4x1xf32, #tpu.memory_space<vmem>>, vector<4x1xf32>
    %c0_9 = arith.constant 0 : index
    %c0_10 = arith.constant 0 : index
    %19 = vector.load %arg4[%c0_9, %c0_10] : memref<4x1xf32, #tpu.memory_space<vmem>>, vector<4x1xf32>
    %20 = vector.broadcast %8 : vector<1x128xf32> to vector<4x128xf32>
    %21 = arith.subf %1, %20 : vector<4x128xf32>
    %22 = vector.broadcast %17 : vector<1x128xf32> to vector<4x128xf32>
    %23 = arith.mulf %21, %22 : vector<4x128xf32>
    %24 = vector.broadcast %18 : vector<4x1xf32> to vector<4x128xf32>
    %25 = arith.mulf %23, %24 : vector<4x128xf32>
    %26 = vector.broadcast %19 : vector<4x1xf32> to vector<4x128xf32>
    %27 = arith.addf %25, %26 : vector<4x128xf32>
    %c0_11 = arith.constant 0 : index
    %c0_12 = arith.constant 0 : index
    %c0_13 = arith.constant 0 : index
    %28 = vector.load %arg5[%c0_11, %c0_12, %c0_13] : memref<1x4x128xf32, #tpu.memory_space<vmem>>, vector<1x4x128xf32>
    %29 = vector.shape_cast %28 : vector<1x4x128xf32> to vector<4x128xf32>
    %30 = vector.shape_cast %27 : vector<4x128xf32> to vector<1x4x128xf32>
    tpu.vector_store %arg5[%c0_11, %c0_12, %c0_13], %30 {strides = array<i32>} : memref<1x4x128xf32, #tpu.memory_space<vmem>>, vector<1x4x128xf32>,
    return
  }
  func.func @transform_0(%arg0: i32, %arg1: i32) -> (i32, i32, i32) {
    %c0_i32 = arith.constant 0 : i32
    %c0_i32_0 = arith.constant 0 : i32
    return %arg0, %c0_i32, %arg1 : i32, i32, i32
  }
  func.func @transform_1(%arg0: i32, %arg1: i32) -> (i32, i32) {
    %c0_i32 = arith.constant 0 : i32
    %c0_i32_0 = arith.constant 0 : i32
    %c0_i32_1 = arith.constant 0 : i32
    return %c0_i32, %c0_i32_0 : i32, i32
  }
  func.func @transform_2(%arg0: i32, %arg1: i32) -> (i32, i32) {
    %c0_i32 = arith.constant 0 : i32
    %c0_i32_0 = arith.constant 0 : i32
    %c0_i32_1 = arith.constant 0 : i32
    return %c0_i32, %c0_i32_0 : i32, i32
  }
  func.func @transform_3(%arg0: i32, %arg1: i32) -> (i32, i32, i32) {
    %c0_i32 = arith.constant 0 : i32
    %c0_i32_0 = arith.constant 0 : i32
    return %arg0, %c0_i32, %arg1 : i32, i32, i32
  }
}

</mosaic_0001>

<bundles_post_ra>
// kernel: tpu_custom_call.1
= control target key start
LH: loop header
LB: loop body
LE: loop exit
PB: predicated region body
PF: predicated region fallthrough
CT: control target
= control target key end

     0   :  { %s1000_s0 = inlined_call_operand.hbm [shape: f32[2,4,256], index: 0, kind: input, shape index: {}]   ;;  %s1001_s1 = inlined_call_operand.hbm [shape: f32[4,1], index: 1, kind: input, shape index: {}]   ;;  %s1002_s2 = inlined_call_operand.hbm [shape: f32[4,1], index: 2, kind: input, shape index: {}]   ;;  %s1003_s3 = inlined_call_operand.hbm [shape: f32[2,4,256], index: 3, kind: output, shape index: {}]  }
   0x1   :  { %1010 = sst [smem:[#allocation14_spill]] %s1001_s1 }
   0x2   :  { %1011 = sst [smem:[#allocation15_spill]] %s1002_s2 }
   0x3   :  { %8 = vsyncpa [#allocation3], 0 }
   0x4   :  { %10 = vsyncpa [#allocation3 + $0x1], 0 }
   0x5   :  { %11 = vsyncpa [#allocation6], 0 }
   0x6   :  { %12 = vsyncpa [#allocation4], 0 }
   0x7   :  { %14 = vsyncpa [#allocation4 + $0x1], 0  ;;  %s727_s12 = smov 0   ;;  %s729_s13 = smov 0  }
   0x8   :  { %s731_s14 = smov 0   ;;  %s733_s15 = smov 0  }
   0x9   :  { %s735_s16 = smov 0   ;;  %s737_s17 = smov 0  }
   0xa   :  { %s739_s18 = smov 0   ;;  %s741_s19 = smov 0  }
   0xb LB: > { %s390_s20 = sadd.s32 4294967295, %s700_s19   ;;  %s391_s21 = sadd.s32 4294967294, %s700_s19   ;;  %s700_s19 = sphi %s741_s19, %s20_s19   ;;  %s696_s18 = sphi %s739_s18, %s1036_s18   ;;  %s692_s17 = sphi %s737_s17, %s1035_s17   ;;  %s688_s16 = sphi %s735_s16, %s1034_s16   ;;  %s684_s15 = sphi %s733_s15, %s1033_s15   ;;  %s680_s14 = sphi %s731_s14, %s1032_s14   ;;  %s676_s13 = sphi %s729_s13, %s1031_s13   ;;  %s672_s12 = sphi %s727_s12, %s1030_s12  }
   0xc   : > { %p54_p0 = scmp.ne.s32.totalorder %s676_s13, %s672_s12  ;;  %p773_p1 = scmp.eq.s32.totalorder %s390_s20, 0 }
   0xd   : > { %p128_p2 = scmp.eq.s32.totalorder %s391_s21, 3  ;;  %p392_p4 = scmp.ge.s32.totalorder %s700_s19, 1 }
   0xe   : > { %s1012_s22 = scalar_select %p773_p1, 1, 0 }
   0xf   : > { %p779_p3 = por %p773_p1, %p54_p0  ;;  %p784_p5 = por %p128_p2, %p54_p0 }
  0x10   : > { %p135_p6 = scmp.lt.s32.totalorder %s700_s19, 5  ;;  %s702_s26 = smov [#allocation5]  }
  0x11   : > { %s1013_s23 = scalar_select %p779_p3, 1, 0 }
  0x12   : > { %s1014_s24 = scalar_select %p784_p5, 1, 0 }
  0x13   : > { %p789_p7 = pnand %p392_p4, %p135_p6  ;;  %s148_s27 = sshll.u32 %s702_s26, 4  ;;  %s149_s27 = int_to_ptr.vmem [resolvable:$true] %s148_s27 }
  0x14   : > { %1015 = sst [smem:[#allocation12_spill]] %s1014_s24  ;;  %s703_s28 = smov [#allocation7]  }
  0x15   : > { %s1016_s25 = scalar_select %p789_p7, 1, 0 }
  0x16   : > { %p421_p8 = pneg %p789_p7  ;;  %s159_s29 = sshll.u32 %s703_s28, 4  ;;  %s801_s29 = int_to_ptr.vmem [resolvable:$true] %s159_s29 }
  0x17   : > { %s1018_s1 = sld [smem:[#allocation14_spill]] }
  0x18   : > { %p797_p9 = pnand %p421_p8, %p773_p1 }
  0x1a   : > { %p514_p11 = pneg %p797_p9 }
  0x1d   : > { %s512_s6 = scalar_lea.hbm %s1018_s1, 64 }
  0x1e   : > { %p513_p10 = scmp.ne.s32.totalorder %s1018_s1, %s512_s6  ;;  %p519_p0 = scmp.lt.u32.totalorder %s512_s6, %s1018_s1 }
  0x20   : > { %p515_p12 = pnand %p514_p11, %p513_p10 }
  0x22   : > { %p516_p13 = pneg %p515_p12 }
  0x24   : > { %p521_p2 = pnand %p519_p0, %p516_p13 }
  0x26   : > { %524 = shalt.err (!%p521_p2)
}
  0x27   : > { %s525_s11 = scalar_lea.vmem %s149_s27, 64  ;;  %p533_p5 = scmp.lt.s32.totalorder %s149_s27, %s149_s27 }
  0x28   : > { %p526_p4 = scmp.ne.s32.totalorder %s149_s27, %s525_s11  ;;  %p534_p1 = scmp.lt.s32.totalorder %s525_s11, %s525_s11 }
  0x2a   : > { %p528_p6 = pnand %p526_p4, %p514_p11  ;;  %p535_p3 = por %p534_p1, %p533_p5 }
  0x2c   : > { %p529_p8 = pneg %p528_p6 }
  0x2e   : > { %p536_p7 = pnand %p535_p3, %p529_p8 }
  0x30   : > { %539 = shalt.err (!%p536_p7)
}
  0x31   : > { %424 = dma.hbm_to_vmem [thread:$0]  (!%p797_p9), %s1018_s1, 64, %s149_s27, [#allocation6]  }
  0x32   : > { %s1019_s2 = sld [smem:[#allocation15_spill]] }
  0x38   : > { %s540_s5 = scalar_lea.hbm %s1019_s2, 64 }
  0x39   : > { %p541_p10 = scmp.ne.s32.totalorder %s1019_s2, %s540_s5  ;;  %p547_p5 = scmp.lt.u32.totalorder %s540_s5, %s1019_s2 }
  0x3b   : > { %p543_p1 = pnand %p541_p10, %p514_p11 }
  0x3d   : > { %p544_p3 = pneg %p543_p1 }
  0x3f   : > { %p549_p7 = pnand %p547_p5, %p544_p3 }
  0x41   : > { %552 = shalt.err (!%p549_p7)
}
  0x42   : > { %s553_s27 = scalar_lea.vmem %s801_s29, 64  ;;  %p561_p2 = scmp.lt.s32.totalorder %s801_s29, %s801_s29 }
  0x43   : > { %p554_p12 = scmp.ne.s32.totalorder %s801_s29, %s553_s27  ;;  %p562_p4 = scmp.lt.s32.totalorder %s553_s27, %s553_s27 }
  0x45   : > { %p556_p13 = pnand %p554_p12, %p514_p11  ;;  %p563_p6 = por %p562_p4, %p561_p2 }
  0x47   : > { %p557_p0 = pneg %p556_p13 }
  0x49   : > { %p564_p8 = pnand %p563_p6, %p557_p0 }
  0x4b   : > { %567 = shalt.err (!%p564_p8)
}
  0x4c   : > { %427 = dma.hbm_to_vmem [thread:$0]  (!%p797_p9), %s1019_s2, 64, %s801_s29, [#allocation6]  }
  0x4d   : > { %p122_p11 = scmp.eq.s32.totalorder %s390_s20, 3  ;;  %s29_s21 = sadd.s32 1, %s692_s17 }
  0x4e   : > { %p30_p10 = scmp.ge.s32.totalorder %s29_s21, 2  ;;  %s32_s30 = sadd.s32 1, %s696_s18 }
  0x4f   : > { %p48_p1 = scmp.ne.s32.totalorder %s680_s14, %s676_s13  ;;  %p49_p3 = scmp.eq.s32.totalorder %s700_s19, 0 }
  0x50   : > { %s1038_s21 = smov (%p30_p10, %s29_s21), 0  ;;  %s1040_s30 = smov (!%p30_p10, %s32_s30), %s696_s18 }
  0x51   : > { %1020 = sst [smem:[#allocation13_spill]] %s1038_s21  ;;  %s37_s26 = ssub.s32 %s692_s17, %s1038_s21 }
  0x52   : > { %s41_s28 = sadd.s32 1, %s680_s14  ;;  %p34_p5 = scmp.ge.s32.totalorder %s1040_s30, 2 }
  0x53   : > { %p863_p9 = por %p122_p11, %p48_p1  ;;  %p867_p7 = por %p49_p3, %p48_p1 }
  0x54   : > { %s170_s4 = sand.u32 1, %s680_s14   ;;  %s1042_s30 = smov (%p34_p5, %s1040_s30), 0 }
  0x55   : > { %p438_p12 = scmp.lt.s32.totalorder %s700_s19, 4  ;;  %s396_s5 = sshll.u32 %s170_s4, 2 }
  0x56   : > { %s36_s6 = ssub.s32 %s696_s18, %s1042_s30  ;;  %s397_s8 = sshll.u32 %s696_s18, 1 }
  0x57   : > { %s38_s7 = sor.u32 %s37_s26, %s36_s6  ;;  %s179_s9 = sadd.s32 %s692_s17, %s397_s8 }
  0x58   : > { %p39_p13 = scmp.eq.s32.totalorder %s38_s7, 0  ;;  %s398_s27 = sshll.u32 %s179_s9, 6 }
  0x59   : > { %s174_s10 = scalar_lea.vmem [#allocation2], %s396_s5  ;;  %s885_s24 = scalar_lea.hbm %s1000_s0, %s398_s27 }
  0x5a   : > { %s183_s11 = sshll.u32 %s174_s10, 4  ;;  %p893_p0 = pnand %p438_p12, %p867_p7  ;;  %s887_s11 = int_to_ptr.vmem [resolvable:$true] %s183_s11 }
  0x5b   : > { %s880_s1 = scalar_select %p39_p13, %s680_s14, %s41_s28  }
  0x5c   : > { %s171_s28 = scalar_lea.sflag [#allocation3], %s170_s4  ;;  %s568_s5 = scalar_lea.hbm %s885_s24, 64 }
  0x5d   : > { %p569_p2 = scmp.ne.s32.totalorder %s885_s24, %s568_s5  ;;  %p570_p4 = pneg %p893_p0 }
  0x5e   : > { %s573_s20 = scalar_lea.hbm %s1000_s0, 256  ;;  %p574_p11 = scmp.lt.u32.totalorder %s885_s24, %s1000_s0 }
  0x5f   : > { %p571_p6 = pnand %p570_p4, %p569_p2  ;;  %p575_p10 = scmp.lt.u32.totalorder %s573_s20, %s568_s5 }
  0x60   : > { %p577_p3 = scmp.lt.u32.totalorder %s568_s5, %s885_s24 }
  0x61   : > { %p572_p8 = pneg %p571_p6  ;;  %p576_p1 = por %p575_p10, %p574_p11 }
  0x63   : > { %p578_p5 = por %p577_p3, %p576_p1 }
  0x65   : > { %p579_p7 = pnand %p578_p5, %p572_p8 }
  0x67   : > { %582 = shalt.err (!%p579_p7)
}
  0x68   : > { %s583_s4 = scalar_lea.vmem %s887_s11, 64  ;;  %s704_s8 = smov [#allocation2]  }
  0x69   : > { %p584_p12 = scmp.ne.s32.totalorder %s887_s11, %s583_s4  ;;  %s588_s9 = sshll.u32 %s704_s8, 4  ;;  %s589_s9 = int_to_ptr.vmem [resolvable:$false] %s588_s9 }
  0x6a   : > { %s590_s27 = scalar_lea.vmem %s589_s9, 128  ;;  %p591_p6 = scmp.lt.s32.totalorder %s887_s11, %s589_s9 }
  0x6b   : > { %p586_p13 = pnand %p584_p12, %p570_p4  ;;  %p592_p11 = scmp.lt.s32.totalorder %s590_s27, %s583_s4 }
  0x6d   : > { %p587_p2 = pneg %p586_p13  ;;  %p593_p10 = por %p592_p11, %p591_p6 }
  0x6f   : > { %p594_p1 = pnand %p593_p10, %p587_p2 }
  0x71   : > { %597 = shalt.err (!%p594_p1)
}
  0x72   : > { %431 = dma.hbm_to_vmem [thread:$0]  (!%p893_p0), %s885_s24, 64, %s887_s11, %s171_s28  }
  0x73   : > { %p1024_p8 = scmp.ne.s32.totalorder %s1016_s25, 0 }
  0x74   : > { %s925_s10 = sand.u32 (!%p1024_p8), 1, %s676_s13   ;;  %p1025_p4 = scmp.ne.s32.totalorder (!%p1024_p8), %s1013_s23, 0 }
  0x75   : > { %192 = sbr.rel (%p1024_p8) target bundleno = 278 (0x116), region = 32  ;;  %s400_s5 = sshll.u32 (!%p1024_p8), %s925_s10, 2 }
  0x76   : > { %s195_s2 = scalar_lea.sflag (!%p1024_p8), [#allocation3], %s925_s10  ;;  %s198_s21 = scalar_lea.vmem (!%p1024_p8), [#allocation2], %s400_s5 }
  0x7c   : > { %659 = dma.done.wait (%p1025_p4), %s195_s2, 64  }
  0x7d   : > { %661 = vsyncadd (%p1025_p4), %s195_s2, 4294967232  ;;  %p1026_p0 = scmp.ne.s32.totalorder %s1012_s22, 0 }
  0x7f   : > { %663 = dma.done.wait (%p1026_p0), [#allocation6], 128  }
  0x80   : > { %665 = vsyncadd (%p1026_p0), [#allocation6], 4294967168  ;;  %v705_v0 = vmov 0   ;;  %v253_v1 = vld [vmem:[#allocation5] sm:$0xf]  ;;  %vm230_vm0 = vcmask 1043456  }
  0x81   : > { %509 = vset.pattern.permute.xlu0 %v705_v0  ;;  %v254_v2 = vld [vmem:[#allocation7] sm:$0xf]  ;;  %v229_v3 = vld [vmem:[%s198_s21] sm:$0xf]  ;;  %s405_s22 = sshll.u32 %s688_s16, 1  ;;  %s228_s25 = scalar_lea.vmem [#allocation8], %s400_s5 }
  0x82   : > { %259 = vperm.xlu0 %509, %v253_v1   ;;  %v231_v4 = vsel %vm230_vm0, %v229_v3, 0.0  ;;  %v238_v5 = vmul.f32 %v229_v3, %v229_v3  ;;  %s282_s23 = sadd.s32 %s684_s15, %s405_s22  ;;  %s286_s11 = sshll.u32 %s228_s25, 4  ;;  %s948_s11 = int_to_ptr.vmem [resolvable:$true] %s286_s11 }
  0x83   : > { %v232_v6 = vrot.slane %v231_v4, 4  ;;  %s406_s24 = sshll.u32 %s282_s23, 6  ;;  %s271_s15 = scalar_lea.sflag [#allocation4], %s925_s10 }
  0x84   : > { %v239_v7 = vsel %vm230_vm0, %v238_v5, 0.0  ;;  %s946_s20 = scalar_lea.hbm %s1003_s3, %s406_s24  ;;  %s598_s16 = scalar_lea.vmem %s948_s11, 64 }
  0x85   : > { %v233_v8 = vadd.f32 %v232_v6, %v231_v4  ;;  %v240_v9 = vrot.slane %v239_v7, 4  ;;  %p599_p3 = scmp.ne.s32.totalorder %s948_s11, %s598_s16  ;;  %s706_s6 = smov [#allocation8]  }
  0x86   : > { %265 = vperm.xlu0 %509, %v254_v2   ;;  %s602_s7 = sshll.u32 %s706_s6, 4  ;;  %s603_s7 = int_to_ptr.vmem [resolvable:$false] %s602_s7 }
  0x87   : > { %v234_v10 = vrot.slane %v233_v8, 2  ;;  %v241_v11 = vadd.f32 %v240_v9, %v239_v7  ;;  %p600_p5 = pnand %p599_p3, %p863_p9  ;;  %s604_s4 = scalar_lea.vmem %s603_s7, 128 }
  0x88   : > { %p605_p12 = scmp.lt.s32.totalorder %s948_s11, %s603_s7  ;;  %p606_p13 = scmp.lt.s32.totalorder %s604_s4, %s598_s16 }
  0x89   : > { %v235_v12 = vadd.f32 %v234_v10, %v233_v8  ;;  %v242_v13 = vrot.slane %v241_v11, 2  ;;  %p601_p7 = pneg %p600_p5 }
  0x8a   : > { %p607_p2 = por %p606_p13, %p605_p12 }
  0x8b   : > { %v236_v14 = vrot.slane %v235_v12, 1  ;;  %v243_v15 = vadd.f32 %v242_v13, %v241_v11 }
  0x8c   : > { %p608_p6 = pnand %p607_p2, %p601_p7 }
  0x8d   : > { %v237_v16 = vadd.f32 %v236_v14, %v235_v12  ;;  %v244_v17 = vrot.slane %v243_v15, 1 }
  0x8f   : > { %v245_v18 = vadd.f32 %v244_v17, %v243_v15  ;;  %v246_v19 = vmul.f32 0.25, %v237_v16 }
  0x91   : > { %v247_v20 = vmul.f32 0.25, %v245_v18  ;;  %v248_v21 = vmul.f32 %v246_v19, %v246_v19  ;;  %v255_v25 = vsub.f32 %v229_v3, %v246_v19 }
  0x93   : > { %v249_v22 = vsub.f32 %v247_v20, %v248_v21 }
  0x95   : > { %v250_v23 = vmax.f32 %v249_v22, 0.0 }
  0x97   : > { %v251_v24 = vadd.f32 1e-05, %v250_v23 }
  0x99   : > { %510 = vrsqrt.f32 %v251_v24 }
  0xa3   : > { %v511_v26 = vpop.eup %510 }
  0xa4   : > { %v256_v27 = vmul.f32 %v511_v26, %v255_v25 }
 0x101   : > { %v260_v28 = vpop.permute.xlu0 %259 }
 0x102   : > { %v262_v29 = vmul.f32 %v260_v28, %v256_v27 }
 0x105   : > { %v266_v30 = vpop.permute.xlu0 %265 }
 0x106   : > { %v268_v31 = vadd.f32 %v266_v30, %v262_v29 }
 0x108   : > { %269 = vst [vmem:[%s228_s25] sm:$0xf] %v268_v31 }
 0x109   : > { %611 = shalt.err (!%p608_p6)
}
 0x10a   : > { %s612_s8 = scalar_lea.hbm %s946_s20, 64  ;;  %s616_s10 = scalar_lea.hbm %s1003_s3, 256 }
 0x10b   : > { %p613_p11 = scmp.ne.s32.totalorder %s946_s20, %s612_s8  ;;  %p617_p8 = scmp.lt.u32.totalorder %s946_s20, %s1003_s3 }
 0x10c   : > { %p618_p4 = scmp.lt.u32.totalorder %s616_s10, %s612_s8  ;;  %p620_p3 = scmp.lt.u32.totalorder %s612_s8, %s946_s20 }
 0x10d   : > { %p614_p10 = pnand %p613_p11, %p863_p9 }
 0x10e   : > { %p619_p0 = por %p618_p4, %p617_p8 }
 0x10f   : > { %p615_p1 = pneg %p614_p10 }
 0x110   : > { %p621_p5 = por %p620_p3, %p619_p0 }
 0x112   : > { %p622_p7 = pnand %p621_p5, %p615_p1 }
 0x114   : > { %625 = shalt.err (!%p622_p7)
}
 0x115   : > { %419 = dma.vmem_to_hbm [thread:$0]  (%p863_p9), %s948_s11, 64, %s946_s20, %s271_s15  }
 0x116 PF: > { %s1027_s21 = sld [smem:[#allocation12_spill]]  ;;  %p441_p12 = scmp.ge.s32.totalorder %s700_s19, 2 }
 0x117   : > { %s298_s22 = sand.u32 1, %s672_s12  }
 0x118   : > { %s299_s23 = scalar_lea.sflag [#allocation4], %s298_s22 }
 0x11c   : > { %p1028_p13 = scmp.ne.s32.totalorder %s1027_s21, 0 }
 0x11e   : > { %p433_p2 = pnand %p441_p12, %p1028_p13 }
 0x120   : > { %667 = dma.done.wait (!%p433_p2), %s299_s23, 64  }
 0x121   : > { %669 = vsyncadd (!%p433_p2), %s299_s23, 4294967232  ;;  %s20_s19 = sadd.s32 1, %s700_s19   ;;  %s1029_s29 = sld [smem:[#allocation13_spill]] }
 0x122   : > { %p17_p6 = scmp.ge.s32.totalorder %s20_s19, 6   ;;  %s1030_s12 = smov %s676_s13 }
 0x123   : > { %s1031_s13 = smov %s680_s14  ;;  %s1032_s14 = smov %s880_s1 }
 0x124   : > { %s1033_s15 = smov %s692_s17  ;;  %s1034_s16 = smov %s696_s18 }
 0x125   : > { %s1036_s18 = smov %s1042_s30  ;;  %19 = sbr.rel (!%p17_p6) target bundleno = 11 (0xb), region = 85 }
 0x127   : > { %s1035_s17 = smov %s1029_s29 }
 0x12c   :  { %304 = vsyncpa [#allocation3], 1 }
 0x12d   :  { %306 = vsyncpa [#allocation3 + $0x1], 1 }
 0x12e   :  { %307 = vsyncpa [#allocation6], 1 }
 0x12f   :  { %308 = vsyncpa [#allocation4], 1 }
 0x130   :  { %310 = vsyncpa [#allocation4 + $0x1], 1 }

</bundles_post_ra>
